<compile_context>
chip_gen: v7x
topology: tpu7x:2x2x1
jax: 0.10.0
libtpu: 0.0.40
codegen_flags: <defaults>
</compile_context>

<pallas_src>
import numpy as np

import jax
import jax.numpy as jnp
from jax.experimental import pallas as pl
from jax.experimental.pallas import tpu as pltpu

HIDDEN = 64


# ---------------------------------------------------------------------------
# Pallas kernel: one GCNConv layer (feature-major, block-diagonal tile skip)
# ---------------------------------------------------------------------------
def gcn_layer_kernel(ktab_ref, kcnt_ref, a_ref, hw_ref, b_ref, out_ref, acc_ref):
    """out[:, j_tile] = relu(sum_k HW[:, k_tile] @ A_hat[k_tile, j_tile] + b).

    ktab_ref: SMEM int32 (num_j * band,)  k-tile index for step (j, s)
    kcnt_ref: SMEM int32 (num_j,)         number of active k tiles for tile j
    a_ref:    (tk, tn)   bf16 tile of the symmetric normalized adjacency
    hw_ref:   (num_k, 64, tk) bf16 resident banded W^T @ H^T (whole layer)
    b_ref:    (64, 1)    f32 resident bias
    out_ref:  (64, tn)   bf16 lane-dense output tile
    acc_ref:  (64, tn)   f32 VMEM accumulator scratch
    """
    j = pl.program_id(0)
    s = pl.program_id(1)
    band = pl.num_programs(1)
    nk = kcnt_ref[j]

    @pl.when(s == 0)
    def _():
        acc_ref[...] = jnp.zeros_like(acc_ref)

    # Only the active part of the band does work; padded steps re-point at the
    # previous A tile (no new DMA) and are skipped here.
    @pl.when(s < nk)
    def _():
        k = ktab_ref[j * band + s]
        acc_ref[...] += jnp.dot(hw_ref[k], a_ref[...],
                                preferred_element_type=jnp.float32)

    @pl.when(s == nk - 1)
    def _():
        out_ref[...] = jnp.maximum(acc_ref[...] + b_ref[...], 0.0
                                   ).astype(out_ref.dtype)


def gcn_layer(a_bf16, hw_banded, b, ktab, kcnt, *, tn, tk, max_band):
    """One GCNConv layer.  a_bf16: (n_pad, n_pad) bf16; hw_banded: (num_k, 64, tk)
    bf16; b: (64, 1) f32.  Returns (64, n_pad) bf16 = relu(HW @ A_hat + b)."""
    n_pad = a_bf16.shape[0]
    num_k, f_out, _ = hw_banded.shape
    num_j = n_pad // tn

    def a_index(j, s, ktab_ref, kcnt_ref):
        # Data-dependent tile walk: only tiles inside the block-diagonal band.
        return (ktab_ref[j * max_band + s], j)

    return pl.pallas_call(
        gcn_layer_kernel,
        out_shape=jax.ShapeDtypeStruct((f_out, n_pad), jnp.bfloat16),
        grid_spec=pltpu.PrefetchScalarGridSpec(
            num_scalar_prefetch=2,
            grid=(num_j, max_band),                       # reduction axis last
            in_specs=[
                pl.BlockSpec((tk, tn), a_index),                      # A tile
                pl.BlockSpec((num_k, f_out, tk),
                             lambda j, s, ktab, kcnt: (0, 0, 0)),      # HW resident
                pl.BlockSpec((f_out, 1),
                             lambda j, s, ktab, kcnt: (0, 0)),         # bias resident
            ],
            out_specs=pl.BlockSpec((f_out, tn),
                                   lambda j, s, ktab, kcnt: (0, j)),
            scratch_shapes=[pltpu.VMEM((f_out, tn), jnp.float32)],
        ),
        compiler_params=pltpu.CompilerParams(
            dimension_semantics=("parallel", "arbitrary"),
            vmem_limit_bytes=32 * 1024 * 1024),
    )(ktab, kcnt, a_bf16, hw_banded, b)


# ---------------------------------------------------------------------------
# Plain-JAX / host glue: adjacency build, tile schedule, pooling, tiny head
# ---------------------------------------------------------------------------
def _round_up(x, m):
    return ((x + m - 1) // m) * m


def build_norm_adj_padded_bf16(edge_index, num_nodes, n_pad):
    """D^{-1/2} (A + I) D^{-1/2}, scattered directly into one padded bf16-bound
    buffer (single NxN materialization), matching PyG gcn_norm defaults."""
    src, dst = edge_index[0], edge_index[1]
    ones = jnp.ones(src.shape[0], jnp.float32)
    deg = jax.ops.segment_sum(ones, dst, num_segments=num_nodes) + 1.0
    dinv = jnp.where(deg > 0, 1.0 / jnp.sqrt(deg), 0.0)
    a = jnp.zeros((n_pad, n_pad), jnp.float32)
    a = a.at[dst, src].add(dinv[dst] * dinv[src])       # message: src -> dst
    idx = jnp.arange(num_nodes)
    a = a.at[idx, idx].add(dinv * dinv)                 # self loops
    return a.astype(jnp.bfloat16)


def _tile_schedule(batch_np, n, tile):
    """Per-column-tile band of active source tiles (block-diagonal skip).

    Requires a concrete (host) batch vector with contiguous graph ids, as
    produced by PyG batching.  Returns (ktab flat int32, kcnt int32, max_band).
    """
    batch_np = np.asarray(batch_np)
    assert batch_np.shape[0] == n
    assert np.all(np.diff(batch_np) >= 0), "batch ids must be contiguous/sorted"
    num_tiles = (n + tile - 1) // tile
    num_graphs = int(batch_np[-1]) + 1
    starts = np.searchsorted(batch_np, np.arange(num_graphs), side="left")
    ends = np.searchsorted(batch_np, np.arange(num_graphs), side="right")

    klo = np.empty(num_tiles, np.int64)
    khi = np.empty(num_tiles, np.int64)
    for j in range(num_tiles):
        lo_col = j * tile
        hi_col = min((j + 1) * tile, n) - 1
        g_lo = int(batch_np[lo_col])
        g_hi = int(batch_np[hi_col])
        klo[j] = starts[g_lo] // tile
        khi[j] = (ends[g_hi] - 1) // tile
    kcnt = (khi - klo + 1).astype(np.int32)
    max_band = int(kcnt.max())

    ktab = np.empty((num_tiles, max_band), np.int32)
    for j in range(num_tiles):
        for s in range(max_band):
            # Padded steps repeat the last active tile -> no extra DMA.
            ktab[j, s] = klo[j] + min(s, int(kcnt[j]) - 1)
    return jnp.asarray(ktab.reshape(-1)), jnp.asarray(kcnt), max_band


def gcn3_forward(x, edge_index, batch, params, num_graphs):
    n, f_in = x.shape
    # Lane/reduction tile: bigger tiles amortize per-step overhead & DMA setup.
    tile = 512 if n >= 1024 else (256 if n >= 512 else 128)
    n_pad = _round_up(n, tile)
    num_k = n_pad // tile

    a_pad = build_norm_adj_padded_bf16(edge_index, n, n_pad)
    # Host-side block-diagonal tile schedule (batch must be concrete here).
    ktab, kcnt, max_band = _tile_schedule(np.asarray(batch), n, tile)

    def to_banded(hw):  # (64, n_pad) -> (num_k, 64, tile), bf16
        return hw.reshape(HIDDEN, num_k, tile).transpose(1, 0, 2)

    # Layer 1: hoisted feature transform HW = (X W1)^T in XLA, cast to bf16 once.
    x_pad = jnp.zeros((n_pad, f_in), jnp.float32).at[:n, :].set(x)
    hw = to_banded((x_pad @ params["w1"]).T.astype(jnp.bfloat16))
    h = gcn_layer(a_pad, hw, params["b1"].T, ktab, kcnt,
                  tn=tile, tk=tile, max_band=max_band)

    for wk, bk in (("w2", "b2"), ("w3", "b3")):
        hw = to_banded(jnp.dot(params[wk].T.astype(jnp.bfloat16), h,
                               preferred_element_type=jnp.float32
                               ).astype(jnp.bfloat16))
        h = gcn_layer(a_pad, hw, params[bk].T, ktab, kcnt,
                      tn=tile, tk=tile, max_band=max_band)

    # global_add_pool (segment_sum, no dense one-hot) + tiny 64->1 head in XLA.
    h_nodes = h[:, :n].astype(jnp.float32).T                   # (n, 64)
    pooled = jax.ops.segment_sum(h_nodes, batch, num_segments=num_graphs)
    return pooled @ params["wo"] + params["bo"]


# ---------------------------------------------------------------------------
# Params and f32 reference
# ---------------------------------------------------------------------------
def init_params(key, num_node_features, hidden=HIDDEN):
    ks = jax.random.split(key, 8)

    def glorot(k, fan_in, fan_out):
        limit = np.sqrt(6.0 / (fan_in + fan_out))
        return jax.random.uniform(k, (fan_in, fan_out), jnp.float32, -limit, limit)

    def lin_uniform(k, fan_in, fan_out):
        limit = 1.0 / np.sqrt(fan_in)
        return jax.random.uniform(k, (fan_in, fan_out), jnp.float32, -limit, limit)

    return {
        "w1": glorot(ks[0], num_node_features, hidden),
        "b1": jnp.zeros((1, hidden), jnp.float32),
        "w2": glorot(ks[1], hidden, hidden),
        "b2": jnp.zeros((1, hidden), jnp.float32),
        "w3": glorot(ks[2], hidden, hidden),
        "b3": jnp.zeros((1, hidden), jnp.float32),
        "wo": lin_uniform(ks[3], hidden, 1),
        "bo": lin_uniform(ks[4], hidden, 1)[:1, :].reshape(1, 1),
    }


def build_norm_adj_dense(edge_index, num_nodes):
    src, dst = edge_index[0], edge_index[1]
    a = jnp.zeros((num_nodes, num_nodes), jnp.float32)
    a = a.at[dst, src].add(1.0)
    a = a + jnp.eye(num_nodes, dtype=jnp.float32)
    deg = a.sum(axis=1)
    dinv = jnp.where(deg > 0, 1.0 / jnp.sqrt(deg), 0.0)
    return dinv[:, None] * a * dinv[None, :]


def gcn3_reference(x, edge_index, batch, params, num_graphs):
    """Pure-JAX f32 reference for correctness check."""
    a_hat = build_norm_adj_dense(edge_index, x.shape[0])
    h = x
    for wk, bk in (("w1", "b1"), ("w2", "b2"), ("w3", "b3")):
        h = jnp.maximum(a_hat @ (h @ params[wk]) + params[bk], 0.0)
    pooled = jax.ops.segment_sum(h, batch, num_segments=num_graphs)
    return pooled @ params["wo"] + params["bo"]


# ---------------------------------------------------------------------------
# Test driver
# ---------------------------------------------------------------------------
if __name__ == "__main__":
    key = jax.random.PRNGKey(0)
    k_param, k_a, k_b = jax.random.split(key, 3)

    num_node_features = 4
    params = init_params(k_param, num_node_features)

    def make_batch(graph_sizes, kx):
        n = sum(graph_sizes)
        x = jax.random.normal(kx, (n, num_node_features), jnp.float32)
        src, dst = [], []
        off = 0
        for sz in graph_sizes:            # bidirectional ring within each graph
            for i in range(sz):
                jn = (i + 1) % sz
                src += [off + i, off + jn]
                dst += [off + jn, off + i]
            off += sz
        edge_index = jnp.array([src, dst], dtype=jnp.int32)
        batch = jnp.concatenate([jnp.full((sz,), g, jnp.int32)
                                 for g, sz in enumerate(graph_sizes)])
        return x, edge_index, batch

    # Case 1: tiny batch (single tile).  Case 2: multi-tile batch that
    # exercises the block-diagonal band schedule (graphs straddle tiles).
    for graph_sizes, kk in (((8, 8), k_a), ((96, 112, 80), k_b)):
        x, edge_index, batch = make_batch(graph_sizes, kk)
        num_graphs = len(graph_sizes)

        out = gcn3_forward(x, edge_index, batch, params, num_graphs)
        out = jax.block_until_ready(out)
        ref = gcn3_reference(x, edge_index, batch, params, num_graphs)

        assert out.shape == (num_graphs, 1)
        # Tolerance loosened vs the f32 reference because A_hat and the hoisted
        # HW operand run in bf16 (with f32 accumulation).
        np.testing.assert_allclose(np.asarray(out), np.asarray(ref),
                                   rtol=5e-2, atol=5e-2)

    print("KERNEL_OK")
</pallas_src>

<mosaic_0001>
module attributes {stable_mosaic.version = 11 : i64} {
  func.func @gcn_layer_kernel(%arg0: i32, %arg1: i32, %arg2: memref<1xi32, #tpu.memory_space<smem>>, %arg3: memref<1xi32, #tpu.memory_space<smem>>, %arg4: memref<128x128xbf16, #tpu.memory_space<vmem>>, %arg5: memref<1x64x128xbf16, #tpu.memory_space<vmem>>, %arg6: memref<64x1xf32, #tpu.memory_space<vmem>>, %arg7: memref<64x128xbf16, #tpu.memory_space<vmem>>, %arg8: memref<64x128xf32, #tpu.memory_space<vmem>>) attributes {dimension_semantics = [#tpu.dimension_semantics<parallel>, #tpu.dimension_semantics<arbitrary>], iteration_bounds = array<i64: 1, 1>, scalar_prefetch = 2 : i64, scratch_operands = 1 : i64, tpu.core_type = #tpu.core_type<tc>, window_params = [{transform_indices = @transform_0, window_bounds = array<i64: 128, 128>}, {pipeline_mode = #tpu.pipeline_mode<synchronous>, transform_indices = @transform_1, window_bounds = array<i64: 1, 64, 128>}, {pipeline_mode = #tpu.pipeline_mode<synchronous>, transform_indices = @transform_2, window_bounds = array<i64: 64, 1>}, {transform_indices = @transform_3, window_bounds = array<i64: 64, 128>}]} {
    %0 = arith.index_cast %arg0 : i32 to index
    %1 = memref.load %arg3[%0] : memref<1xi32, #tpu.memory_space<smem>>
    %c0_i32 = arith.constant 0 : i32
    %2 = arith.cmpi eq, %arg1, %c0_i32 : i32
    %3 = arith.extui %2 : i1 to i32
    %c0_i32_0 = arith.constant 0 : i32
    %4 = arith.cmpi ne, %3, %c0_i32_0 : i32
    scf.if %4 {
      %cst = arith.constant 0.000000e+00 : f32
      %12 = vector.broadcast %cst : f32 to vector<64x128xf32>
      %c0 = arith.constant 0 : index
      %c0_3 = arith.constant 0 : index
      %13 = vector.load %arg8[%c0, %c0_3] : memref<64x128xf32, #tpu.memory_space<vmem>>, vector<64x128xf32>
      tpu.vector_store %arg8[%c0, %c0_3], %12 {strides = array<i32>} : memref<64x128xf32, #tpu.memory_space<vmem>>, vector<64x128xf32>,
    } else {
    }
    %5 = arith.cmpi slt, %arg1, %1 : i32
    %6 = arith.extui %5 : i1 to i32
    %c0_i32_1 = arith.constant 0 : i32
    %7 = arith.cmpi ne, %6, %c0_i32_1 : i32
    scf.if %7 {
      %c1_i32_3 = arith.constant 1 : i32
      %12 = arith.muli %arg0, %c1_i32_3 : i32
      %13 = arith.addi %12, %arg1 : i32
      %14 = arith.index_cast %13 : i32 to index
      %15 = memref.load %arg2[%14] : memref<1xi32, #tpu.memory_space<smem>>
      %c0 = arith.constant 0 : index
      %c0_4 = arith.constant 0 : index
      %16 = vector.load %arg8[%c0, %c0_4] : memref<64x128xf32, #tpu.memory_space<vmem>>, vector<64x128xf32>
      %17 = arith.index_cast %15 : i32 to index
      %c0_5 = arith.constant 0 : index
      %c0_6 = arith.constant 0 : index
      %18 = vector.load %arg5[%17, %c0_5, %c0_6] : memref<1x64x128xbf16, #tpu.memory_space<vmem>>, vector<1x64x128xbf16>
      %19 = vector.shape_cast %18 : vector<1x64x128xbf16> to vector<64x128xbf16>
      %c0_7 = arith.constant 0 : index
      %c0_8 = arith.constant 0 : index
      %20 = vector.load %arg4[%c0_7, %c0_8] : memref<128x128xbf16, #tpu.memory_space<vmem>>, vector<128x128xbf16>
      %cst = arith.constant dense<0.000000e+00> : vector<64x128xf32>
      %21 = tpu.matmul %19, %20, %cst {dimension_numbers = #tpu.dot_dimension_numbers<[1], [0], [0], [1], [0, 0, 1, 1], [], []>} : vector<64x128xbf16>, vector<128x128xbf16>, vector<64x128xf32> -> vector<64x128xf32>
      %22 = arith.addf %16, %21 : vector<64x128xf32>
      %c0_9 = arith.constant 0 : index
      %c0_10 = arith.constant 0 : index
      %23 = vector.load %arg8[%c0_9, %c0_10] : memref<64x128xf32, #tpu.memory_space<vmem>>, vector<64x128xf32>
      tpu.vector_store %arg8[%c0_9, %c0_10], %22 {strides = array<i32>} : memref<64x128xf32, #tpu.memory_space<vmem>>, vector<64x128xf32>,
    } else {
    }
    %c1_i32 = arith.constant 1 : i32
    %8 = arith.subi %1, %c1_i32 : i32
    %9 = arith.cmpi eq, %arg1, %8 : i32
    %10 = arith.extui %9 : i1 to i32
    %c0_i32_2 = arith.constant 0 : i32
    %11 = arith.cmpi ne, %10, %c0_i32_2 : i32
    scf.if %11 {
      %c0 = arith.constant 0 : index
      %c0_3 = arith.constant 0 : index
      %12 = vector.load %arg8[%c0, %c0_3] : memref<64x128xf32, #tpu.memory_space<vmem>>, vector<64x128xf32>
      %c0_4 = arith.constant 0 : index
      %c0_5 = arith.constant 0 : index
      %13 = vector.load %arg6[%c0_4, %c0_5] : memref<64x1xf32, #tpu.memory_space<vmem>>, vector<64x1xf32>
      %14 = vector.broadcast %13 : vector<64x1xf32> to vector<64x128xf32>
      %15 = arith.addf %12, %14 : vector<64x128xf32>
      %cst = arith.constant 0.000000e+00 : f32
      %16 = vector.broadcast %cst : f32 to vector<64x128xf32>
      %17 = arith.maximumf %15, %16 : vector<64x128xf32>
      %18 = arith.truncf %17 : vector<64x128xf32> to vector<64x128xbf16>
      %c0_6 = arith.constant 0 : index
      %c0_7 = arith.constant 0 : index
      %19 = vector.load %arg7[%c0_6, %c0_7] : memref<64x128xbf16, #tpu.memory_space<vmem>>, vector<64x128xbf16>
      tpu.vector_store %arg7[%c0_6, %c0_7], %18 {strides = array<i32>} : memref<64x128xbf16, #tpu.memory_space<vmem>>, vector<64x128xbf16>,
    } else {
    }
    return
  }
  func.func @transform_0(%arg0: i32, %arg1: i32, %arg2: memref<1xi32, #tpu.memory_space<smem>>, %arg3: memref<1xi32, #tpu.memory_space<smem>>) -> (i32, i32) {
    %c1_i32 = arith.constant 1 : i32
    %0 = arith.muli %arg0, %c1_i32 : i32
    %1 = arith.addi %0, %arg1 : i32
    %2 = arith.index_cast %1 : i32 to index
    %3 = memref.load %arg2[%2] : memref<1xi32, #tpu.memory_space<smem>>
    %c0_i32 = arith.constant 0 : i32
    return %3, %arg0 : i32, i32
  }
  func.func @transform_1(%arg0: i32, %arg1: i32, %arg2: memref<1xi32, #tpu.memory_space<smem>>, %arg3: memref<1xi32, #tpu.memory_space<smem>>) -> (i32, i32, i32) {
    %c0_i32 = arith.constant 0 : i32
    %c0_i32_0 = arith.constant 0 : i32
    %c0_i32_1 = arith.constant 0 : i32
    %c0_i32_2 = arith.constant 0 : i32
    return %c0_i32, %c0_i32_0, %c0_i32_1 : i32, i32, i32
  }
  func.func @transform_2(%arg0: i32, %arg1: i32, %arg2: memref<1xi32, #tpu.memory_space<smem>>, %arg3: memref<1xi32, #tpu.memory_space<smem>>) -> (i32, i32) {
    %c0_i32 = arith.constant 0 : i32
    %c0_i32_0 = arith.constant 0 : i32
    %c0_i32_1 = arith.constant 0 : i32
    return %c0_i32, %c0_i32_0 : i32, i32
  }
  func.func @transform_3(%arg0: i32, %arg1: i32, %arg2: memref<1xi32, #tpu.memory_space<smem>>, %arg3: memref<1xi32, #tpu.memory_space<smem>>) -> (i32, i32) {
    %c0_i32 = arith.constant 0 : i32
    %c0_i32_0 = arith.constant 0 : i32
    return %c0_i32, %arg0 : i32, i32
  }
}

</mosaic_0001>

<bundles_post_ra>
// kernel: tpu_custom_call.1
= control target key start
LH: loop header
LB: loop body
LE: loop exit
PB: predicated region body
PF: predicated region fallthrough
CT: control target
= control target key end

     0   :  { %s703_s0 = inlined_call_operand.<no memory space> [shape: s32[1], index: 0, kind: input, shape index: {}]   ;;  %s704_s1 = inlined_call_operand.<no memory space> [shape: s32[1], index: 1, kind: input, shape index: {}]   ;;  %s705_s2 = inlined_call_operand.vmem [shape: bf16[128,128], index: 2, kind: input, shape index: {}]   ;;  %s706_s3 = inlined_call_operand.hbm [shape: bf16[1,64,128], index: 3, kind: input, shape index: {}]   ;;  %s707_s4 = inlined_call_operand.vmem [shape: f32[64,1], index: 4, kind: input, shape index: {}]   ;;  %s708_s5 = inlined_call_operand.hbm [shape: bf16[64,128], index: 5, kind: output, shape index: {}]  }
   0x1   :  { %10 = sst [smem:[#allocation4]] %s703_s0 }
   0x2   :  { %12 = vsyncpa [#allocation7], 0 }
   0x3   :  { %13 = vsyncpa [#allocation8], 0  ;;  %s591_s20 = smov [#allocation6]   ;;  %s543_s24 = scalar_lea.hbm %s706_s3, 512 }
   0x4   :  { %s31_s21 = sshll.u32 %s591_s20, 4  ;;  %p544_p0 = scmp.ne.s32.totalorder %s706_s3, %s543_s24  ;;  %s32_s21 = int_to_ptr.vmem [resolvable:$true] %s31_s21 }
   0x5   :  { %p547_p1 = scmp.lt.u32.totalorder %s543_s24, %s706_s3 }
   0x7   :  { %p549_p2 = pnand %p547_p1, %p544_p0 }
   0x9   :  { %552 = shalt.err (!%p549_p2)
}
   0xa   :  { %s553_s0 = scalar_lea.vmem %s32_s21, 512  ;;  %p558_p4 = scmp.lt.s32.totalorder %s32_s21, %s32_s21 }
   0xb   :  { %p554_p3 = scmp.ne.s32.totalorder %s32_s21, %s553_s0  ;;  %p559_p5 = scmp.lt.s32.totalorder %s553_s0, %s553_s0 }
   0xd   :  { %p560_p6 = por %p559_p5, %p558_p4 }
   0xf   :  { %p561_p7 = pnand %p560_p6, %p554_p3 }
  0x11   :  { %564 = shalt.err (!%p561_p7)
}
  0x12   :  { %s592_s29 = smov 64   ;;  %s593_s30 = smov 4  }
  0x13   :  { %37 = dma.hbm_to_vmem [thread:$0]  %s706_s3, 512, %s32_s21, [#allocation7], %s592_s29, %s592_s29, %s593_s30  }
  0x14   :  { %587 = dma.done.wait [#allocation7], 512  }
  0x15   :  { %588 = vsyncadd [#allocation7], 4294966784  ;;  %s51_s8 = sld [smem:[#allocation4]]  ;;  %v594_v0 = vmov 0.0   ;;  %p413_p9 = scmp.le.s32.totalorder %s704_s1, 0 }
  0x16   :  { %66 = vst [vmem:[#allocation2] sm:$0xff] %v594_v0  ;;  %67 = vst [vmem:[#allocation2 + $0x8] sm:$0xff] %v594_v0 }
  0x17   :  { %68 = vst [vmem:[#allocation2 + $0x10] sm:$0xff] %v594_v0  ;;  %69 = vst [vmem:[#allocation2 + $0x18] sm:$0xff] %v594_v0 }
  0x18   :  { %70 = vst [vmem:[#allocation2 + $0x20] sm:$0xff] %v594_v0  ;;  %71 = vst [vmem:[#allocation2 + $0x28] sm:$0xff] %v594_v0 }
  0x19   :  { %72 = vst [vmem:[#allocation2 + $0x30] sm:$0xff] %v594_v0  ;;  %73 = vst [vmem:[#allocation2 + $0x38] sm:$0xff] %v594_v0 }
  0x1a   :  { %77 = sbr.rel (%p413_p9) target bundleno = 284 (0x11c), region = 25 }
  0x1b   :  { %s410_s9 = sshll.u32 %s51_s8, 4 }
  0x1c   :  { %p53_p8 = scmp.lt.s32.totalorder %s410_s9, 15 }
  0x1d   :  { %v80_v15 = vld [vmem:[#allocation2] sm:$0xff] (!%p413_p9)  ;;  %v81_v25 = vld [vmem:[#allocation2 + $0x8] sm:$0xff] (!%p413_p9) }
  0x1e   :  { %s710_s9 = smov (!%p53_p8, %s410_s9), 15  ;;  %v82_v13 = vld [vmem:[#allocation2 + $0x10] sm:$0xff] (!%p413_p9)  ;;  %v83_v19 = vld [vmem:[#allocation2 + $0x18] sm:$0xff] (!%p413_p9) }
  0x1f   :  { %s411_s10 = sshll.u32 %s710_s9, 2  ;;  %v84_v16 = vld [vmem:[#allocation2 + $0x20] sm:$0xff] (!%p413_p9)  ;;  %v85_v26 = vld [vmem:[#allocation2 + $0x28] sm:$0xff] (!%p413_p9) }
  0x20   :  { %s648_s3 = scalar_lea.vmem %s705_s2, %s411_s10  ;;  %s79_s2 = sld [smem:[#allocation4]] (!%p413_p9)  ;;  %v86_v14 = vld [vmem:[#allocation2 + $0x30] sm:$0xff] (!%p413_p9)  ;;  %v87_v20 = vld [vmem:[#allocation2 + $0x38] sm:$0xff] (!%p413_p9) }
  0x21   :  { %v529_v1 = vld [vmem:[%s648_s3] sm:$0xff]   ;;  %v530_v2 = vld [vmem:[%s648_s3 + $0x8] sm:$0xff]   ;;  %v531_v3 = vld [vmem:[%s648_s3 + $0x10] sm:$0xff]  }
  0x22   :  { %483 = vmatprep.subr.bf16.mxu0 %v529_v1  ;;  %507 = vmatprep.subr.bf16.mxu1 %v529_v1  ;;  %v532_v4 = vld [vmem:[%s648_s3 + $0x18] sm:$0xff]   ;;  %v533_v5 = vld [vmem:[%s648_s3 + $0x20] sm:$0xff]   ;;  %v534_v6 = vld [vmem:[%s648_s3 + $0x28] sm:$0xff]  }
  0x23   :  { %484 = vmatpush3.bf16.msra.mxu0 %v529_v1  ;;  %515 = vmatpush3.bf16.msra.mxu1 %v529_v1  ;;  %v535_v9 = vld [vmem:[%s648_s3 + $0x30] sm:$0xff]   ;;  %v536_v10 = vld [vmem:[%s648_s3 + $0x38] sm:$0xff]  }
  0x24   :  { %485 = vmatprep.subr.bf16.mxu0 %v530_v2  ;;  %508 = vmatprep.subr.bf16.mxu1 %v530_v2 }
  0x26   :  { %s439_s15 = sshll.u32 %s79_s2, 5 }
  0x27   :  { %486 = vmatpush3.bf16.msra.mxu0 %v530_v2  ;;  %516 = vmatpush3.bf16.msra.mxu1 %v530_v2  ;;  %s90_s16 = scalar_lea.vmem [#allocation6], %s439_s15 }
  0x28   :  { %487 = vmatprep.subr.bf16.mxu0 %v531_v3  ;;  %509 = vmatprep.subr.bf16.mxu1 %v531_v3  ;;  %v537_v7 = vld [vmem:[%s90_s16] sm:$0xff]   ;;  %v538_v8 = vld [vmem:[%s90_s16 + $0x10] sm:$0xff]   ;;  %v539_v11 = vld [vmem:[%s90_s16 + $0x8] sm:$0xff]  }
  0x29   :  { %499 = vmatprep.mubr.bf16.mxu0 %v537_v7  ;;  %503 = vmatprep.mubr.bf16.mxu1 %v538_v8  ;;  %v540_v12 = vld [vmem:[%s90_s16 + $0x18] sm:$0xff]  }
  0x2b   :  { %488 = vmatpush3.bf16.msra.mxu0 %v531_v3  ;;  %517 = vmatpush3.bf16.msra.mxu1 %v531_v3 }
  0x2c   :  { %489 = vmatprep.subr.bf16.mxu0 %v532_v4  ;;  %510 = vmatprep.subr.bf16.mxu1 %v532_v4 }
  0x2f   :  { %490 = vmatpush3.bf16.msra.mxu0 %v532_v4  ;;  %518 = vmatpush3.bf16.msra.mxu1 %v532_v4 }
  0x30   :  { %491 = vmatprep.subr.bf16.mxu0 %v533_v5  ;;  %511 = vmatprep.subr.bf16.mxu1 %v533_v5 }
  0x33   :  { %492 = vmatpush3.bf16.msra.mxu0 %v533_v5  ;;  %519 = vmatpush3.bf16.msra.mxu1 %v533_v5 }
  0x34   :  { %493 = vmatprep.subr.bf16.mxu0 %v534_v6  ;;  %512 = vmatprep.subr.bf16.mxu1 %v534_v6 }
  0x37   :  { %494 = vmatpush3.bf16.msra.mxu0 %v534_v6  ;;  %520 = vmatpush3.bf16.msra.mxu1 %v534_v6 }
  0x38   :  { %495 = vmatprep.subr.bf16.mxu0 %v535_v9  ;;  %513 = vmatprep.subr.bf16.mxu1 %v535_v9 }
  0x3b   :  { %496 = vmatpush3.bf16.msra.mxu0 %v535_v9  ;;  %521 = vmatpush3.bf16.msra.mxu1 %v535_v9 }
  0x3c   :  { %497 = vmatprep.subr.bf16.mxu0 %v536_v10  ;;  %514 = vmatprep.subr.bf16.mxu1 %v536_v10 }
  0x3f   :  { %498 = vmatpush3.bf16.msra.mxu0 %v536_v10  ;;  %522 = vmatpush3.bf16.msra.mxu1 %v536_v10 }
  0x42   :  { %500 = vmatmul.mubr.bf16.vlgmr.msra.gmra.mrb[0].mxu0 %v539_v11  ;;  %504 = vmatmul.mubr.bf16.vlgmr.msra.gmra.mrb[0].mxu1 %v540_v12 }
 0x115   :  { %v501_v17 = vpop.f32.mrb[0].mxu0  ;;  %v505_v18 = vpop.f32.mrb[0].mxu1 }
 0x116   :  { %v254_v21 = vadd.f32 %v501_v17, %v82_v13  ;;  %v258_v22 = vadd.f32 %v505_v18, %v86_v14  ;;  %v221_v23 = vpop.f32.mrb[1].mxu0  ;;  %v237_v24 = vpop.f32.mrb[1].mxu1 }
 0x117   :  { %v252_v27 = vadd.f32 %v221_v23, %v80_v15  ;;  %v256_v28 = vadd.f32 %v237_v24, %v84_v16  ;;  %v502_v29 = vpop.f32.mrb[2].mxu0  ;;  %v506_v30 = vpop.f32.mrb[2].mxu1 }
 0x118   :  { %262 = vst [vmem:[#allocation2 + $0x10] sm:$0xff] %v254_v21  ;;  %266 = vst [vmem:[#allocation2 + $0x30] sm:$0xff] %v258_v22  ;;  %v255_v31 = vadd.f32 %v502_v29, %v83_v19  ;;  %v259_v32 = vadd.f32 %v506_v30, %v87_v20  ;;  %v224_v33 = vpop.f32.mrb[3].mxu0  ;;  %v240_v34 = vpop.f32.mrb[3].mxu1 }
 0x119   :  { %260 = vst [vmem:[#allocation2] sm:$0xff] %v252_v27  ;;  %264 = vst [vmem:[#allocation2 + $0x20] sm:$0xff] %v256_v28  ;;  %v253_v35 = vadd.f32 %v224_v33, %v81_v25  ;;  %v257_v36 = vadd.f32 %v240_v34, %v85_v26 }
 0x11a   :  { %263 = vst [vmem:[#allocation2 + $0x18] sm:$0xff] %v255_v31  ;;  %267 = vst [vmem:[#allocation2 + $0x38] sm:$0xff] %v259_v32 }
 0x11b   :  { %261 = vst [vmem:[#allocation2 + $0x8] sm:$0xff] %v253_v35  ;;  %265 = vst [vmem:[#allocation2 + $0x28] sm:$0xff] %v257_v36 }
 0x11c PF:  { %s428_s19 = sadd.s32 4294967295, %s704_s1 }
 0x11d   :  { %p430_p10 = scmp.ne.s32.totalorder %s428_s19, 0 }
 0x11e   :  { %v283_v37 = vld [vmem:[%s707_s4 + $0x10] sm:$0xff] (!%p430_p10)  ;;  %v281_v38 = vld [vmem:[%s707_s4] sm:$0xff] (!%p430_p10)  ;;  %v595_v39 = vmov (!%p430_p10), 0   ;;  %v284_v40 = vld [vmem:[%s707_s4 + $0x18] sm:$0xff] (!%p430_p10) }
 0x11f   :  { %272 = sbr.rel (%p430_p10) target bundleno = 435 (0x1b3), region = 29  ;;  %542 = vset.pattern.permute.xlu1 (!%p430_p10), %v595_v39  ;;  %541 = vset.pattern.permute.xlu0 (!%p430_p10), %v595_v39  ;;  %v282_v41 = vld [vmem:[%s707_s4 + $0x8] sm:$0xff] (!%p430_p10)  ;;  %v285_v43 = vld [vmem:[%s707_s4 + $0x20] sm:$0xff] (!%p430_p10)  ;;  %v288_v44 = vld [vmem:[%s707_s4 + $0x38] sm:$0xff] (!%p430_p10) }
 0x120   :  { %301 = vperm.xlu1 (!%p430_p10), %542, %v283_v37   ;;  %291 = vperm.xlu0 (!%p430_p10), %541, %v281_v38   ;;  %v286_v42 = vld [vmem:[%s707_s4 + $0x28] sm:$0xff] (!%p430_p10)  ;;  %v287_v45 = vld [vmem:[%s707_s4 + $0x30] sm:$0xff] (!%p430_p10)  ;;  %v273_v49 = vld [vmem:[#allocation2] sm:$0xff] (!%p430_p10) }
 0x121   :  { %v275_v47 = vld [vmem:[#allocation2 + $0x10] sm:$0xff] (!%p430_p10)  ;;  %v276_v50 = vld [vmem:[#allocation2 + $0x18] sm:$0xff] (!%p430_p10)  ;;  %v277_v59 = vld [vmem:[#allocation2 + $0x20] sm:$0xff] (!%p430_p10) }
 0x122   :  { %v274_v51 = vld [vmem:[#allocation2 + $0x8] sm:$0xff] (!%p430_p10)  ;;  %v280_v6 = vld [vmem:[#allocation2 + $0x38] sm:$0xff] (!%p430_p10)  ;;  %v279_v7 = vld [vmem:[#allocation2 + $0x30] sm:$0xff] (!%p430_p10) }
 0x123   :  { %v278_v58 = vld [vmem:[#allocation2 + $0x28] sm:$0xff] (!%p430_p10) }
 0x124   :  { %306 = vperm.xlu1 (!%p430_p10), %542, %v284_v40   ;;  %296 = vperm.xlu0 (!%p430_p10), %541, %v282_v41  }
 0x128   :  { %316 = vperm.xlu1 %542, %v286_v42   ;;  %311 = vperm.xlu0 %541, %v285_v43  }
 0x12c   :  { %326 = vperm.xlu1 %542, %v288_v44   ;;  %321 = vperm.xlu0 %541, %v287_v45  }
 0x19f   :  { %v302_v46 = vpop.permute.xlu1 %301  ;;  %v292_v48 = vpop.permute.xlu0 %291 }
 0x1a0   :  { %v331_v52 = vadd.f32 %v302_v46, %v275_v47  ;;  %v329_v53 = vadd.f32 %v292_v48, %v273_v49 }
 0x1a2   :  { %v339_v60 = vmax.f32 %v331_v52, 0.0  ;;  %v337_v61 = vmax.f32 %v329_v53, 0.0 }
 0x1a3   :  { %v307_v54 = vpop.permute.xlu1 %306  ;;  %v297_v55 = vpop.permute.xlu0 %296 }
 0x1a4   :  { %v332_v56 = vadd.f32 %v307_v54, %v276_v50  ;;  %v330_v57 = vadd.f32 %v297_v55, %v274_v51 }
 0x1a6   :  { %v340_v62 = vmax.f32 %v332_v56, 0.0  ;;  %v338_v63 = vmax.f32 %v330_v57, 0.0 }
 0x1a7   :  { %v317_v0 = vpop.permute.xlu1 %316  ;;  %v312_v1 = vpop.permute.xlu0 %311 }
 0x1a8   :  { %v456_v2 = vpack.c.bf16 %v340_v62, %v339_v60  ;;  %v451_v3 = vpack.c.bf16 %v338_v63, %v337_v61  ;;  %v334_v4 = vadd.f32 %v317_v0, %v278_v58  ;;  %v333_v5 = vadd.f32 %v312_v1, %v277_v59 }
 0x1aa   :  { %468 = vst [vmem:[#allocation9 + $0x8] sm:$0xff] %v456_v2   ;;  %452 = vst [vmem:[#allocation9] sm:$0xff] %v451_v3   ;;  %v342_v8 = vmax.f32 %v334_v4, 0.0  ;;  %v341_v9 = vmax.f32 %v333_v5, 0.0 }
 0x1ab   :  { %v327_v10 = vpop.permute.xlu1 %326  ;;  %v322_v11 = vpop.permute.xlu0 %321 }
 0x1ac   :  { %v461_v12 = vpack.c.bf16 %v342_v8, %v341_v9  ;;  %v336_v13 = vadd.f32 %v327_v10, %v280_v6  ;;  %v335_v14 = vadd.f32 %v322_v11, %v279_v7 }
 0x1ae   :  { %469 = vst [vmem:[#allocation9 + $0x10] sm:$0xff] %v461_v12   ;;  %v344_v15 = vmax.f32 %v336_v13, 0.0  ;;  %v343_v16 = vmax.f32 %v335_v14, 0.0 }
 0x1b0   :  { %v466_v17 = vpack.c.bf16 %v344_v15, %v343_v16 }
 0x1b2   :  { %470 = vst [vmem:[#allocation9 + $0x18] sm:$0xff] %v466_v17  }
 0x1b3 PF:  { %s596_s4 = smov [#allocation9]  }
 0x1b4   :  { %s390_s11 = sshll.u32 %s596_s4, 4  ;;  %s391_s11 = int_to_ptr.vmem [resolvable:$true] %s390_s11 }
 0x1b5   :  { %s565_s12 = scalar_lea.vmem %s391_s11, 512  ;;  %p570_p12 = scmp.lt.s32.totalorder %s391_s11, %s391_s11 }
 0x1b6   :  { %p566_p11 = scmp.ne.s32.totalorder %s391_s11, %s565_s12  ;;  %p571_p13 = scmp.lt.s32.totalorder %s565_s12, %s565_s12 }
 0x1b8   :  { %p572_p0 = por %p571_p13, %p570_p12 }
 0x1ba   :  { %p573_p1 = pnand %p572_p0, %p566_p11 }
 0x1bc   :  { %576 = shalt.err (!%p573_p1)
}
 0x1bd   :  { %s577_s14 = scalar_lea.hbm %s708_s5, 512 }
 0x1be   :  { %p578_p2 = scmp.ne.s32.totalorder %s708_s5, %s577_s14  ;;  %p581_p3 = scmp.lt.u32.totalorder %s577_s14, %s708_s5 }
 0x1c0   :  { %p583_p4 = pnand %p581_p3, %p578_p2 }
 0x1c2   :  { %586 = shalt.err (!%p583_p4)
}
 0x1c3   :  { %396 = dma.vmem_to_hbm [thread:$0]  %s391_s11, 512, %s708_s5, [#allocation8], %s592_s29, %s592_s29, %s593_s30  }
 0x1c4   :  { %589 = dma.done.wait [#allocation8], 512  }
 0x1c5   :  { %590 = vsyncadd [#allocation8], 4294966784 }
 0x1c6   :  { %400 = vsyncpa [#allocation7], 1 }
 0x1c7   :  { %401 = vsyncpa [#allocation8], 1 }

</bundles_post_ra>
